<compile_context>
chip_gen: v6e
topology: v6e:2x2x1
jax: 0.10.0
libtpu: 0.0.40
codegen_flags: <defaults>
</compile_context>

<pallas_src>
import jax
import jax.numpy as jnp
from jax.experimental import pallas as pl
from jax.experimental.pallas import tpu as pltpu

IN_FEATURES = 32 * 32 * 3   # 3072
HIDDEN = 64
NUM_CLASSES = 10
PADDED_CLASSES = 128        # lane-dense output slab (last dim = 128 lanes)
NEG_BIG = -1e30


def mlp_kernel(x_ref, w1_ref, b1_ref, w2_ref, b2_ref, w3_ref, b3_ref,
               w4_ref, b4_ref, o_ref):
    x = x_ref[...]                                              # (TB, 3072) bf16

    h1 = jnp.dot(x, w1_ref[...], preferred_element_type=jnp.float32) + b1_ref[...]
    h1 = jnp.maximum(h1, 0.0).astype(jnp.bfloat16)

    h2 = jnp.dot(h1, w2_ref[...], preferred_element_type=jnp.float32) + b2_ref[...]
    h2 = jnp.maximum(h2, 0.0).astype(jnp.bfloat16)

    h3 = jnp.dot(h2, w3_ref[...], preferred_element_type=jnp.float32) + b3_ref[...]
    h3 = jnp.maximum(h3, 0.0).astype(jnp.bfloat16)

    # Padded class columns (>= NUM_CLASSES) carry a -1e30 bias, so after the
    # max-subtracted softmax they contribute exactly 0 probability mass.
    logits = jnp.dot(h3, w4_ref[...], preferred_element_type=jnp.float32) + b4_ref[...]

    m = jnp.max(logits, axis=-1, keepdims=True)
    e = jnp.exp(logits - m)
    denom = jnp.sum(e, axis=-1, keepdims=True)
    o_ref[...] = (e / denom).astype(o_ref.dtype)


def _round_up(n, m):
    return ((n + m - 1) // m) * m


def init_params(key):
    """Deterministic init mimicking torch.nn.Linear defaults (uniform +-1/sqrt(fan_in))."""
    dims = [(IN_FEATURES, HIDDEN), (HIDDEN, HIDDEN), (HIDDEN, HIDDEN),
            (HIDDEN, NUM_CLASSES)]
    params = []
    for i, (fan_in, fan_out) in enumerate(dims):
        kw, kb = jax.random.split(jax.random.fold_in(key, i))
        bound = 1.0 / jnp.sqrt(jnp.float32(fan_in))
        w = jax.random.uniform(kw, (fan_in, fan_out), jnp.float32, -bound, bound)
        b = jax.random.uniform(kb, (1, fan_out), jnp.float32, -bound, bound)
        params.append((w, b))
    return params


def mlp_forward(x_nchw, params, *, tb_max=512):
    b = x_nchw.shape[0]
    x = x_nchw.reshape(b, IN_FEATURES)   # same order as torch .view on NCHW

    # Batch tile: multiple of 8 sublanes, capped at tb_max (fits comfortably
    # in default scoped VMEM on v5e/v6e/v7x with bf16 x).
    tb = min(tb_max, _round_up(b, 8))
    bp = _round_up(b, tb)
    if bp != b:
        x = jnp.pad(x, ((0, bp - b), (0, 0)))
    x = x.astype(jnp.bfloat16)

    (w1, b1), (w2, b2), (w3, b3), (w4, b4) = params
    # bf16 weights for the MXU; biases stay f32 (post-dot math is f32).
    w1, w2, w3 = (w.astype(jnp.bfloat16) for w in (w1, w2, w3))
    pad_n = PADDED_CLASSES - NUM_CLASSES
    w4 = jnp.pad(w4, ((0, 0), (0, pad_n))).astype(jnp.bfloat16)
    b4 = jnp.pad(b4, ((0, 0), (0, pad_n)), constant_values=NEG_BIG)

    grid = (bp // tb,)

    def resident(shape):
        return pl.BlockSpec(shape, lambda i: (0,) * len(shape))

    in_specs = [
        pl.BlockSpec((tb, IN_FEATURES), lambda i: (i, 0)),
        resident(w1.shape), resident(b1.shape),
        resident(w2.shape), resident(b2.shape),
        resident(w3.shape), resident(b3.shape),
        resident(w4.shape), resident(b4.shape),
    ]
    out_spec = pl.BlockSpec((tb, PADDED_CLASSES), lambda i: (i, 0))

    flops = 2 * bp * (IN_FEATURES * HIDDEN + 2 * HIDDEN * HIDDEN
                      + HIDDEN * PADDED_CLASSES)
    bytes_accessed = (
        int(x.size) * x.dtype.itemsize
        + sum(int(a.size) * a.dtype.itemsize
              for a in (w1, b1, w2, b2, w3, b3, w4, b4))
        + bp * PADDED_CLASSES * 4)
    cost = pl.CostEstimate(flops=flops,
                           transcendentals=bp * PADDED_CLASSES,
                           bytes_accessed=bytes_accessed)

    out_padded = pl.pallas_call(
        mlp_kernel,
        out_shape=jax.ShapeDtypeStruct((bp, PADDED_CLASSES), jnp.float32),
        grid_spec=pltpu.PrefetchScalarGridSpec(
            num_scalar_prefetch=0,
            grid=grid,
            in_specs=in_specs,
            out_specs=out_spec,
        ),
        compiler_params=pltpu.CompilerParams(
            dimension_semantics=("parallel",)),
        cost_estimate=cost,
    )(x, w1, b1, w2, b2, w3, b3, w4, b4)

    return out_padded[:b, :NUM_CLASSES]


def mlp_reference(x_nchw, params):
    """Pure-JAX f32 reference of the PyTorch forward."""
    x = x_nchw.reshape(x_nchw.shape[0], IN_FEATURES)
    (w1, b1), (w2, b2), (w3, b3), (w4, b4) = params
    h = jnp.maximum(x @ w1 + b1, 0.0)
    h = jnp.maximum(h @ w2 + b2, 0.0)
    h = jnp.maximum(h @ w3 + b3, 0.0)
    return jax.nn.softmax(h @ w4 + b4, axis=-1)


if __name__ == "__main__":
    key = jax.random.PRNGKey(0)
    k_x, k_p = jax.random.split(key)

    # small batch of CIFAR-shaped inputs
    x = jax.random.normal(k_x, (2, 3, 32, 32), jnp.float32)
    params = init_params(k_p)

    out = mlp_forward(x, params)
    out = jax.block_until_ready(out)

    # sanity: shape, softmax rows sum to ~1, and matches f32 reference
    # (loose tolerance for bf16 matmul inputs with f32 accumulation)
    assert out.shape == (2, NUM_CLASSES)
    assert jnp.allclose(jnp.sum(out, axis=1), 1.0, atol=1e-5)
    ref = mlp_reference(x, params)
    assert jnp.allclose(out, ref, atol=5e-2), float(jnp.max(jnp.abs(out - ref)))

    print("KERNEL_OK")
</pallas_src>

<mosaic_0001>
module attributes {stable_mosaic.version = 11 : i64} {
  func.func @mlp_kernel(%arg0: i32, %arg1: memref<8x3072xbf16, #tpu.memory_space<vmem>>, %arg2: memref<3072x64xbf16, #tpu.memory_space<vmem>>, %arg3: memref<1x64xf32, #tpu.memory_space<vmem>>, %arg4: memref<64x64xbf16, #tpu.memory_space<vmem>>, %arg5: memref<1x64xf32, #tpu.memory_space<vmem>>, %arg6: memref<64x64xbf16, #tpu.memory_space<vmem>>, %arg7: memref<1x64xf32, #tpu.memory_space<vmem>>, %arg8: memref<64x128xbf16, #tpu.memory_space<vmem>>, %arg9: memref<1x128xf32, #tpu.memory_space<vmem>>, %arg10: memref<8x128xf32, #tpu.memory_space<vmem>>) attributes {dimension_semantics = [#tpu.dimension_semantics<parallel>], iteration_bounds = array<i64: 1>, scalar_prefetch = 0 : i64, scratch_operands = 0 : i64, tpu.core_type = #tpu.core_type<tc>, window_params = [{transform_indices = @transform_0, window_bounds = array<i64: 8, 3072>}, {pipeline_mode = #tpu.pipeline_mode<synchronous>, transform_indices = @transform_1, window_bounds = array<i64: 3072, 64>}, {pipeline_mode = #tpu.pipeline_mode<synchronous>, transform_indices = @transform_2, window_bounds = array<i64: 1, 64>}, {pipeline_mode = #tpu.pipeline_mode<synchronous>, transform_indices = @transform_3, window_bounds = array<i64: 64, 64>}, {pipeline_mode = #tpu.pipeline_mode<synchronous>, transform_indices = @transform_4, window_bounds = array<i64: 1, 64>}, {pipeline_mode = #tpu.pipeline_mode<synchronous>, transform_indices = @transform_5, window_bounds = array<i64: 64, 64>}, {pipeline_mode = #tpu.pipeline_mode<synchronous>, transform_indices = @transform_6, window_bounds = array<i64: 1, 64>}, {pipeline_mode = #tpu.pipeline_mode<synchronous>, transform_indices = @transform_7, window_bounds = array<i64: 64, 128>}, {pipeline_mode = #tpu.pipeline_mode<synchronous>, transform_indices = @transform_8, window_bounds = array<i64: 1, 128>}, {transform_indices = @transform_9, window_bounds = array<i64: 8, 128>}]} {
    %c0 = arith.constant 0 : index
    %c0_0 = arith.constant 0 : index
    %0 = vector.load %arg1[%c0, %c0_0] : memref<8x3072xbf16, #tpu.memory_space<vmem>>, vector<8x3072xbf16>
    %c0_1 = arith.constant 0 : index
    %c0_2 = arith.constant 0 : index
    %1 = vector.load %arg2[%c0_1, %c0_2] : memref<3072x64xbf16, #tpu.memory_space<vmem>>, vector<3072x64xbf16>
    %cst = arith.constant dense<0.000000e+00> : vector<8x64xf32>
    %2 = tpu.matmul %0, %1, %cst {dimension_numbers = #tpu.dot_dimension_numbers<[1], [0], [0], [1], [0, 0, 1, 1], [], []>} : vector<8x3072xbf16>, vector<3072x64xbf16>, vector<8x64xf32> -> vector<8x64xf32>
    %c0_3 = arith.constant 0 : index
    %c0_4 = arith.constant 0 : index
    %3 = vector.load %arg3[%c0_3, %c0_4] : memref<1x64xf32, #tpu.memory_space<vmem>>, vector<1x64xf32>
    %4 = vector.broadcast %3 : vector<1x64xf32> to vector<8x64xf32>
    %5 = arith.addf %2, %4 : vector<8x64xf32>
    %cst_5 = arith.constant 0.000000e+00 : f32
    %6 = vector.broadcast %cst_5 : f32 to vector<8x64xf32>
    %7 = arith.maximumf %5, %6 : vector<8x64xf32>
    %8 = arith.truncf %7 : vector<8x64xf32> to vector<8x64xbf16>
    %c0_6 = arith.constant 0 : index
    %c0_7 = arith.constant 0 : index
    %9 = vector.load %arg4[%c0_6, %c0_7] : memref<64x64xbf16, #tpu.memory_space<vmem>>, vector<64x64xbf16>
    %cst_8 = arith.constant dense<0.000000e+00> : vector<8x64xf32>
    %10 = tpu.matmul %8, %9, %cst_8 {dimension_numbers = #tpu.dot_dimension_numbers<[1], [0], [0], [1], [0, 0, 1, 1], [], []>} : vector<8x64xbf16>, vector<64x64xbf16>, vector<8x64xf32> -> vector<8x64xf32>
    %c0_9 = arith.constant 0 : index
    %c0_10 = arith.constant 0 : index
    %11 = vector.load %arg5[%c0_9, %c0_10] : memref<1x64xf32, #tpu.memory_space<vmem>>, vector<1x64xf32>
    %12 = vector.broadcast %11 : vector<1x64xf32> to vector<8x64xf32>
    %13 = arith.addf %10, %12 : vector<8x64xf32>
    %cst_11 = arith.constant 0.000000e+00 : f32
    %14 = vector.broadcast %cst_11 : f32 to vector<8x64xf32>
    %15 = arith.maximumf %13, %14 : vector<8x64xf32>
    %16 = arith.truncf %15 : vector<8x64xf32> to vector<8x64xbf16>
    %c0_12 = arith.constant 0 : index
    %c0_13 = arith.constant 0 : index
    %17 = vector.load %arg6[%c0_12, %c0_13] : memref<64x64xbf16, #tpu.memory_space<vmem>>, vector<64x64xbf16>
    %cst_14 = arith.constant dense<0.000000e+00> : vector<8x64xf32>
    %18 = tpu.matmul %16, %17, %cst_14 {dimension_numbers = #tpu.dot_dimension_numbers<[1], [0], [0], [1], [0, 0, 1, 1], [], []>} : vector<8x64xbf16>, vector<64x64xbf16>, vector<8x64xf32> -> vector<8x64xf32>
    %c0_15 = arith.constant 0 : index
    %c0_16 = arith.constant 0 : index
    %19 = vector.load %arg7[%c0_15, %c0_16] : memref<1x64xf32, #tpu.memory_space<vmem>>, vector<1x64xf32>
    %20 = vector.broadcast %19 : vector<1x64xf32> to vector<8x64xf32>
    %21 = arith.addf %18, %20 : vector<8x64xf32>
    %cst_17 = arith.constant 0.000000e+00 : f32
    %22 = vector.broadcast %cst_17 : f32 to vector<8x64xf32>
    %23 = arith.maximumf %21, %22 : vector<8x64xf32>
    %24 = arith.truncf %23 : vector<8x64xf32> to vector<8x64xbf16>
    %c0_18 = arith.constant 0 : index
    %c0_19 = arith.constant 0 : index
    %25 = vector.load %arg8[%c0_18, %c0_19] : memref<64x128xbf16, #tpu.memory_space<vmem>>, vector<64x128xbf16>
    %cst_20 = arith.constant dense<0.000000e+00> : vector<8x128xf32>
    %26 = tpu.matmul %24, %25, %cst_20 {dimension_numbers = #tpu.dot_dimension_numbers<[1], [0], [0], [1], [0, 0, 1, 1], [], []>} : vector<8x64xbf16>, vector<64x128xbf16>, vector<8x128xf32> -> vector<8x128xf32>
    %c0_21 = arith.constant 0 : index
    %c0_22 = arith.constant 0 : index
    %27 = vector.load %arg9[%c0_21, %c0_22] : memref<1x128xf32, #tpu.memory_space<vmem>>, vector<1x128xf32>
    %28 = vector.broadcast %27 : vector<1x128xf32> to vector<8x128xf32>
    %29 = arith.addf %26, %28 : vector<8x128xf32>
    %cst_23 = arith.constant dense<0xFF800000> : vector<8xf32>
    %30 = vector.multi_reduction <maximumf>, %29, %cst_23 [1] : vector<8x128xf32> to vector<8xf32>
    %31 = vector.shape_cast %30 : vector<8xf32> to vector<8x1xf32>
    %32 = vector.broadcast %31 : vector<8x1xf32> to vector<8x128xf32>
    %33 = arith.subf %29, %32 : vector<8x128xf32>
    %34 = math.exp %33 : vector<8x128xf32>
    %cst_24 = arith.constant dense<0.000000e+00> : vector<8xf32>
    %35 = vector.multi_reduction <add>, %34, %cst_24 [1] : vector<8x128xf32> to vector<8xf32>
    %36 = vector.shape_cast %35 : vector<8xf32> to vector<8x1xf32>
    %37 = vector.broadcast %36 : vector<8x1xf32> to vector<8x128xf32>
    %38 = arith.divf %34, %37 : vector<8x128xf32>
    %c0_25 = arith.constant 0 : index
    %c0_26 = arith.constant 0 : index
    %39 = vector.load %arg10[%c0_25, %c0_26] : memref<8x128xf32, #tpu.memory_space<vmem>>, vector<8x128xf32>
    tpu.vector_store %arg10[%c0_25, %c0_26], %38 {strides = array<i32>} : memref<8x128xf32, #tpu.memory_space<vmem>>, vector<8x128xf32>,
    return
  }
  func.func @transform_0(%arg0: i32) -> (i32, i32) {
    %c0_i32 = arith.constant 0 : i32
    %c0_i32_0 = arith.constant 0 : i32
    return %arg0, %c0_i32 : i32, i32
  }
  func.func @transform_1(%arg0: i32) -> (i32, i32) {
    %c0_i32 = arith.constant 0 : i32
    %c0_i32_0 = arith.constant 0 : i32
    %c0_i32_1 = arith.constant 0 : i32
    return %c0_i32, %c0_i32_0 : i32, i32
  }
  func.func @transform_2(%arg0: i32) -> (i32, i32) {
    %c0_i32 = arith.constant 0 : i32
    %c0_i32_0 = arith.constant 0 : i32
    %c0_i32_1 = arith.constant 0 : i32
    return %c0_i32, %c0_i32_0 : i32, i32
  }
  func.func @transform_3(%arg0: i32) -> (i32, i32) {
    %c0_i32 = arith.constant 0 : i32
    %c0_i32_0 = arith.constant 0 : i32
    %c0_i32_1 = arith.constant 0 : i32
    return %c0_i32, %c0_i32_0 : i32, i32
  }
  func.func @transform_4(%arg0: i32) -> (i32, i32) {
    %c0_i32 = arith.constant 0 : i32
    %c0_i32_0 = arith.constant 0 : i32
    %c0_i32_1 = arith.constant 0 : i32
    return %c0_i32, %c0_i32_0 : i32, i32
  }
  func.func @transform_5(%arg0: i32) -> (i32, i32) {
    %c0_i32 = arith.constant 0 : i32
    %c0_i32_0 = arith.constant 0 : i32
    %c0_i32_1 = arith.constant 0 : i32
    return %c0_i32, %c0_i32_0 : i32, i32
  }
  func.func @transform_6(%arg0: i32) -> (i32, i32) {
    %c0_i32 = arith.constant 0 : i32
    %c0_i32_0 = arith.constant 0 : i32
    %c0_i32_1 = arith.constant 0 : i32
    return %c0_i32, %c0_i32_0 : i32, i32
  }
  func.func @transform_7(%arg0: i32) -> (i32, i32) {
    %c0_i32 = arith.constant 0 : i32
    %c0_i32_0 = arith.constant 0 : i32
    %c0_i32_1 = arith.constant 0 : i32
    return %c0_i32, %c0_i32_0 : i32, i32
  }
  func.func @transform_8(%arg0: i32) -> (i32, i32) {
    %c0_i32 = arith.constant 0 : i32
    %c0_i32_0 = arith.constant 0 : i32
    %c0_i32_1 = arith.constant 0 : i32
    return %c0_i32, %c0_i32_0 : i32, i32
  }
  func.func @transform_9(%arg0: i32) -> (i32, i32) {
    %c0_i32 = arith.constant 0 : i32
    %c0_i32_0 = arith.constant 0 : i32
    return %arg0, %c0_i32 : i32, i32
  }
}

</mosaic_0001>

<bundles_post_ra>
// kernel: tpu_custom_call.1
= control target key start
LH: loop header
LB: loop body
LE: loop exit
PB: predicated region body
PF: predicated region fallthrough
CT: control target
= control target key end

     0   :  { %s3974_s0 = inlined_call_operand.vmem [shape: bf16[8,3072], index: 0, kind: input, shape index: {}]   ;;  %s3975_s1 = inlined_call_operand.vmem [shape: bf16[3072,64], index: 1, kind: input, shape index: {}]   ;;  %s3976_s2 = inlined_call_operand.vmem [shape: f32[1,64], index: 2, kind: input, shape index: {}]   ;;  %s3977_s3 = inlined_call_operand.vmem [shape: bf16[64,64], index: 3, kind: input, shape index: {}]   ;;  %s3978_s4 = inlined_call_operand.vmem [shape: f32[1,64], index: 4, kind: input, shape index: {}]   ;;  %s3979_s5 = inlined_call_operand.vmem [shape: bf16[64,64], index: 5, kind: input, shape index: {}]   ;;  %s3980_s6 = inlined_call_operand.vmem [shape: f32[1,64], index: 6, kind: input, shape index: {}]   ;;  %s3981_s7 = inlined_call_operand.vmem [shape: bf16[64,128], index: 7, kind: input, shape index: {}]   ;;  %s3982_s8 = inlined_call_operand.vmem [shape: f32[1,128], index: 8, kind: input, shape index: {}]   ;;  %s3983_s9 = inlined_call_operand.hbm [shape: f32[8,128], index: 9, kind: output, shape index: {}]  }
   0x1   :  { %v2983_v0 = vld [vmem:[%s3975_s1 + $0x78] sm:$0xff]   ;;  %v2987_v4 = vld [vmem:[%s3975_s1 + $0x70] sm:$0xff]   ;;  %v2991_v8 = vld [vmem:[%s3975_s1 + $0x68] sm:$0xff]  }
   0x2   :  { %v2984_v1 = vld [vmem:[%s3975_s1 + $0xf8] sm:$0xff]   ;;  %2665 = vmatprep.subr.bf16.mxu0 %v2983_v0  ;;  %v2988_v5 = vld [vmem:[%s3975_s1 + $0xf0] sm:$0xff]   ;;  %v2992_v9 = vld [vmem:[%s3975_s1 + $0xe8] sm:$0xff]  }
   0x3   :  { %v2985_v2 = vld [vmem:[%s3975_s1 + $0x38] sm:$0xff]   ;;  %2687 = vmatprep.subr.bf16.mxu1 %v2984_v1  ;;  %v2989_v6 = vld [vmem:[%s3975_s1 + $0x30] sm:$0xff]   ;;  %v2993_v10 = vld [vmem:[%s3975_s1 + $0x28] sm:$0xff]  }
   0x4   :  { %v2986_v3 = vld [vmem:[%s3975_s1 + $0xb8] sm:$0xff]   ;;  %2666 = vmatpush3.bf16.msra.mxu0 %v2985_v2  ;;  %v2990_v7 = vld [vmem:[%s3975_s1 + $0xb0] sm:$0xff]   ;;  %v2994_v11 = vld [vmem:[%s3975_s1 + $0xa8] sm:$0xff]  }
   0x5   :  { %2688 = vmatpush3.bf16.msra.mxu1 %v2986_v3  ;;  %2667 = vmatprep.subr.bf16.mxu0 %v2987_v4  ;;  %v2995_v12 = vld [vmem:[%s3975_s1 + $0x60] sm:$0xff]   ;;  %v2999_v16 = vld [vmem:[%s3975_s1 + $0x58] sm:$0xff]   ;;  %v3003_v20 = vld [vmem:[%s3975_s1 + $0x50] sm:$0xff]  }
   0x6   :  { %2689 = vmatprep.subr.bf16.mxu1 %v2988_v5  ;;  %v2996_v13 = vld [vmem:[%s3975_s1 + $0xe0] sm:$0xff]   ;;  %v3000_v17 = vld [vmem:[%s3975_s1 + $0xd8] sm:$0xff]   ;;  %v3004_v21 = vld [vmem:[%s3975_s1 + $0xd0] sm:$0xff]  }
   0x7   :  { %v2997_v14 = vld [vmem:[%s3975_s1 + $0x20] sm:$0xff]   ;;  %v3001_v18 = vld [vmem:[%s3975_s1 + $0x18] sm:$0xff]   ;;  %v3005_v22 = vld [vmem:[%s3975_s1 + $0x10] sm:$0xff]  }
   0x8   :  { %2668 = vmatpush3.bf16.msra.mxu0 %v2989_v6  ;;  %v2998_v15 = vld [vmem:[%s3975_s1 + $0xa0] sm:$0xff]   ;;  %v3002_v19 = vld [vmem:[%s3975_s1 + $0x98] sm:$0xff]   ;;  %v3006_v23 = vld [vmem:[%s3975_s1 + $0x90] sm:$0xff]  }
   0x9   :  { %2690 = vmatpush3.bf16.msra.mxu1 %v2990_v7  ;;  %2669 = vmatprep.subr.bf16.mxu0 %v2991_v8  ;;  %v3007_v24 = vld [vmem:[%s3975_s1 + $0x48] sm:$0xff]   ;;  %v3011_v28 = vld [vmem:[%s3975_s1 + $0x40] sm:$0xff]   ;;  %v3019_v38 = vld [vmem:[%s3975_s1 + $0x178] sm:$0xff]  }
   0xa   :  { %2691 = vmatprep.subr.bf16.mxu1 %v2992_v9  ;;  %v3008_v25 = vld [vmem:[%s3975_s1 + $0xc8] sm:$0xff]   ;;  %v3012_v29 = vld [vmem:[%s3975_s1 + $0xc0] sm:$0xff]   ;;  %v3020_v39 = vld [vmem:[%s3975_s1 + $0x1f8] sm:$0xff]  }
   0xb   :  { %v3009_v26 = vld [vmem:[%s3975_s1 + $0x8] sm:$0xff]   ;;  %v3013_v30 = vld [vmem:[%s3975_s1] sm:$0xff]   ;;  %v3021_v40 = vld [vmem:[%s3975_s1 + $0x138] sm:$0xff]  }
   0xc   :  { %2670 = vmatpush3.bf16.msra.mxu0 %v2993_v10  ;;  %v3010_v27 = vld [vmem:[%s3975_s1 + $0x88] sm:$0xff]   ;;  %v3014_v31 = vld [vmem:[%s3975_s1 + $0x80] sm:$0xff]   ;;  %v3022_v41 = vld [vmem:[%s3975_s1 + $0x1b8] sm:$0xff]  }
   0xd   :  { %2692 = vmatpush3.bf16.msra.mxu1 %v2994_v11  ;;  %2671 = vmatprep.subr.bf16.mxu0 %v2995_v12  ;;  %v34_v32 = vld [vmem:[%s3974_s0] sm:$0xff]  ;;  %v35_v33 = vld [vmem:[%s3974_s0 + $0x8] sm:$0xff]  ;;  %v3023_v42 = vld [vmem:[%s3975_s1 + $0x170] sm:$0xff]  }
   0xe   :  { %2693 = vmatprep.subr.bf16.mxu1 %v2996_v13  ;;  %v2431_v34 = vcombine.low %v34_v32, %v34_v32  ;;  %v2432_v35 = vcombine.high %v34_v32, %v34_v32  ;;  %v2433_v36 = vcombine.low %v35_v33, %v35_v33  ;;  %v2434_v37 = vcombine.high %v35_v33, %v35_v33  ;;  %v3024_v43 = vld [vmem:[%s3975_s1 + $0x1f0] sm:$0xff]   ;;  %v3027_v46 = vld [vmem:[%s3975_s1 + $0x168] sm:$0xff]   ;;  %v3031_v50 = vld [vmem:[%s3975_s1 + $0x160] sm:$0xff]  }
   0xf   :  { %v3025_v44 = vld [vmem:[%s3975_s1 + $0x130] sm:$0xff]   ;;  %v3028_v47 = vld [vmem:[%s3975_s1 + $0x1e8] sm:$0xff]   ;;  %v3032_v51 = vld [vmem:[%s3975_s1 + $0x1e0] sm:$0xff]  }
  0x10   :  { %2672 = vmatpush3.bf16.msra.mxu0 %v2997_v14  ;;  %1705 = vmatprep.mubr.bf16.mxu0 %v2432_v35  ;;  %v3026_v45 = vld [vmem:[%s3975_s1 + $0x1b0] sm:$0xff]   ;;  %v3029_v48 = vld [vmem:[%s3975_s1 + $0x128] sm:$0xff]   ;;  %v3033_v52 = vld [vmem:[%s3975_s1 + $0x120] sm:$0xff]  }
  0x11   :  { %2694 = vmatpush3.bf16.msra.mxu1 %v2998_v15  ;;  %2673 = vmatprep.subr.bf16.mxu0 %v2999_v16  ;;  %v3030_v49 = vld [vmem:[%s3975_s1 + $0x1a8] sm:$0xff]   ;;  %v3034_v53 = vld [vmem:[%s3975_s1 + $0x1a0] sm:$0xff]   ;;  %v3035_v54 = vld [vmem:[%s3975_s1 + $0x158] sm:$0xff]  }
  0x12   :  { %2695 = vmatprep.subr.bf16.mxu1 %v3000_v17  ;;  %1745 = vmatprep.mubr.bf16.mxu1 %v2434_v37  ;;  %v3036_v55 = vld [vmem:[%s3975_s1 + $0x1d8] sm:$0xff]   ;;  %v3039_v58 = vld [vmem:[%s3975_s1 + $0x150] sm:$0xff]   ;;  %v3043_v62 = vld [vmem:[%s3975_s1 + $0x148] sm:$0xff]  }
  0x13   :  { %v3037_v56 = vld [vmem:[%s3975_s1 + $0x118] sm:$0xff]   ;;  %v3040_v59 = vld [vmem:[%s3975_s1 + $0x1d0] sm:$0xff]   ;;  %v3044_v63 = vld [vmem:[%s3975_s1 + $0x1c8] sm:$0xff]  }
  0x14   :  { %2674 = vmatpush3.bf16.msra.mxu0 %v3001_v18  ;;  %v3038_v57 = vld [vmem:[%s3975_s1 + $0x198] sm:$0xff]   ;;  %v3041_v60 = vld [vmem:[%s3975_s1 + $0x110] sm:$0xff]   ;;  %v3045_v0 = vld [vmem:[%s3975_s1 + $0x108] sm:$0xff]  }
  0x15   :  { %2696 = vmatpush3.bf16.msra.mxu1 %v3002_v19  ;;  %2675 = vmatprep.subr.bf16.mxu0 %v3003_v20  ;;  %v3042_v61 = vld [vmem:[%s3975_s1 + $0x190] sm:$0xff]   ;;  %v3046_v1 = vld [vmem:[%s3975_s1 + $0x188] sm:$0xff]   ;;  %v3047_v2 = vld [vmem:[%s3975_s1 + $0x140] sm:$0xff]  }
  0x16   :  { %2697 = vmatprep.subr.bf16.mxu1 %v3004_v21  ;;  %v3048_v3 = vld [vmem:[%s3975_s1 + $0x1c0] sm:$0xff]   ;;  %v36_v6 = vld [vmem:[%s3974_s0 + $0x10] sm:$0xff]  ;;  %v37_v9 = vld [vmem:[%s3974_s0 + $0x18] sm:$0xff] }
  0x17   :  { %v3049_v4 = vld [vmem:[%s3975_s1 + $0x100] sm:$0xff]   ;;  %v2435_v7 = vcombine.low %v36_v6, %v36_v6  ;;  %v2436_v8 = vcombine.high %v36_v6, %v36_v6  ;;  %v2437_v10 = vcombine.low %v37_v9, %v37_v9  ;;  %v2438_v11 = vcombine.high %v37_v9, %v37_v9  ;;  %v3055_v12 = vld [vmem:[%s3975_s1 + $0x278] sm:$0xff]   ;;  %v3059_v16 = vld [vmem:[%s3975_s1 + $0x270] sm:$0xff]  }
  0x18   :  { %2676 = vmatpush3.bf16.msra.mxu0 %v3005_v22  ;;  %v3050_v5 = vld [vmem:[%s3975_s1 + $0x180] sm:$0xff]   ;;  %v3056_v13 = vld [vmem:[%s3975_s1 + $0x2f8] sm:$0xff]   ;;  %v3060_v17 = vld [vmem:[%s3975_s1 + $0x2f0] sm:$0xff]  }
  0x19   :  { %2698 = vmatpush3.bf16.msra.mxu1 %v3006_v23  ;;  %2677 = vmatprep.subr.bf16.mxu0 %v3007_v24  ;;  %v3057_v14 = vld [vmem:[%s3975_s1 + $0x238] sm:$0xff]   ;;  %v3061_v18 = vld [vmem:[%s3975_s1 + $0x230] sm:$0xff]   ;;  %v3063_v20 = vld [vmem:[%s3975_s1 + $0x268] sm:$0xff]  }
  0x1a   :  { %2699 = vmatprep.subr.bf16.mxu1 %v3008_v25  ;;  %v3058_v15 = vld [vmem:[%s3975_s1 + $0x2b8] sm:$0xff]   ;;  %v3062_v19 = vld [vmem:[%s3975_s1 + $0x2b0] sm:$0xff]   ;;  %v3064_v21 = vld [vmem:[%s3975_s1 + $0x2e8] sm:$0xff]  }
  0x1b   :  { %v3065_v22 = vld [vmem:[%s3975_s1 + $0x228] sm:$0xff]   ;;  %v3067_v24 = vld [vmem:[%s3975_s1 + $0x260] sm:$0xff]   ;;  %v3075_v32 = vld [vmem:[%s3975_s1 + $0x250] sm:$0xff]  }
  0x1c   :  { %2678 = vmatpush3.bf16.msra.mxu0 %v3009_v26  ;;  %v3066_v23 = vld [vmem:[%s3975_s1 + $0x2a8] sm:$0xff]   ;;  %v3068_v25 = vld [vmem:[%s3975_s1 + $0x2e0] sm:$0xff]   ;;  %v3076_v33 = vld [vmem:[%s3975_s1 + $0x2d0] sm:$0xff]  }
  0x1d   :  { %2700 = vmatpush3.bf16.msra.mxu1 %v3010_v27  ;;  %2679 = vmatprep.subr.bf16.mxu0 %v3011_v28  ;;  %v3069_v26 = vld [vmem:[%s3975_s1 + $0x220] sm:$0xff]   ;;  %v3071_v28 = vld [vmem:[%s3975_s1 + $0x258] sm:$0xff]   ;;  %v3078_v35 = vld [vmem:[%s3975_s1 + $0x290] sm:$0xff]  }
  0x1e   :  { %2701 = vmatprep.subr.bf16.mxu1 %v3012_v29  ;;  %v3070_v27 = vld [vmem:[%s3975_s1 + $0x2a0] sm:$0xff]   ;;  %v3072_v29 = vld [vmem:[%s3975_s1 + $0x2d8] sm:$0xff]   ;;  %v3080_v37 = vld [vmem:[%s3975_s1 + $0x2c8] sm:$0xff]  }
  0x1f   :  { %v3111_v6 = vld [vmem:[%s3975_s1 + $0x350] sm:$0xff]  }
  0x20   :  { %2680 = vmatpush3.bf16.msra.mxu0 %v3013_v30  ;;  %v3073_v30 = vld [vmem:[%s3975_s1 + $0x218] sm:$0xff]   ;;  %v3114_v9 = vld [vmem:[%s3975_s1 + $0x390] sm:$0xff]  }
  0x21   :  { %2702 = vmatpush3.bf16.msra.mxu1 %v3014_v31  ;;  %2709 = vmatprep.subr.bf16.mxu0 %v3019_v38  ;;  %v3074_v31 = vld [vmem:[%s3975_s1 + $0x298] sm:$0xff]   ;;  %v3081_v38 = vld [vmem:[%s3975_s1 + $0x208] sm:$0xff]  }
  0x22   :  { %2731 = vmatprep.subr.bf16.mxu1 %v3020_v39  ;;  %v3082_v39 = vld [vmem:[%s3975_s1 + $0x288] sm:$0xff]  }
  0x23   :  { %1706 = vmatmul.mubr.bf16.vlgmr.msra.gmra.mxu0 %v2431_v34  ;;  %v3077_v34 = vld [vmem:[%s3975_s1 + $0x210] sm:$0xff]  }
  0x24   :  { %1746 = vmatmul.mubr.bf16.vlgmr.msra.gmra.mxu1 %v2433_v36  ;;  %2710 = vmatpush3.bf16.msra.mxu0 %v3021_v40  ;;  %v3079_v36 = vld [vmem:[%s3975_s1 + $0x248] sm:$0xff]   ;;  %v3083_v40 = vld [vmem:[%s3975_s1 + $0x240] sm:$0xff]  }
  0x25   :  { %2732 = vmatpush3.bf16.msra.mxu1 %v3022_v41  ;;  %2711 = vmatprep.subr.bf16.mxu0 %v3023_v42  ;;  %v3084_v41 = vld [vmem:[%s3975_s1 + $0x2c0] sm:$0xff]  }
  0x26   :  { %2733 = vmatprep.subr.bf16.mxu1 %v3024_v43  ;;  %1785 = vmatprep.mubr.bf16.mxu0 %v2436_v8  ;;  %v3085_v42 = vld [vmem:[%s3975_s1 + $0x200] sm:$0xff]   ;;  %v3113_v8 = vld [vmem:[%s3975_s1 + $0x310] sm:$0xff]  }
  0x27   :  { %1825 = vmatprep.mubr.bf16.mxu1 %v2438_v11  ;;  %v3086_v43 = vld [vmem:[%s3975_s1 + $0x280] sm:$0xff]   ;;  %v3116_v11 = vld [vmem:[%s3975_s1 + $0x3c8] sm:$0xff]  }
  0x28   :  { %2712 = vmatpush3.bf16.msra.mxu0 %v3025_v44  ;;  %v38_v44 = vld [vmem:[%s3974_s0 + $0x20] sm:$0xff] }
  0x29   :  { %2734 = vmatpush3.bf16.msra.mxu1 %v3026_v45  ;;  %2713 = vmatprep.subr.bf16.mxu0 %v3027_v46  ;;  %v39_v45 = vld [vmem:[%s3974_s0 + $0x28] sm:$0xff]  ;;  %v2439_v46 = vcombine.low %v38_v44, %v38_v44 }
  0x2a   :  { %2735 = vmatprep.subr.bf16.mxu1 %v3028_v47  ;;  %v2440_v47 = vcombine.high %v38_v44, %v38_v44  ;;  %v3147_v44 = vld [vmem:[%s3975_s1 + $0x450] sm:$0xff]  }
  0x2c   :  { %2714 = vmatpush3.bf16.msra.mxu0 %v3029_v48  ;;  %v2441_v48 = vcombine.low %v39_v45, %v39_v45 }
  0x2d   :  { %2736 = vmatpush3.bf16.msra.mxu1 %v3030_v49  ;;  %2715 = vmatprep.subr.bf16.mxu0 %v3031_v50  ;;  %v2442_v49 = vcombine.high %v39_v45, %v39_v45  ;;  %v3091_v50 = vld [vmem:[%s3975_s1 + $0x378] sm:$0xff]   ;;  %v3148_v45 = vld [vmem:[%s3975_s1 + $0x4d0] sm:$0xff]  }
  0x2e   :  { %2737 = vmatprep.subr.bf16.mxu1 %v3032_v51  ;;  %v3092_v51 = vld [vmem:[%s3975_s1 + $0x3f8] sm:$0xff]  }
  0x30   :  { %2716 = vmatpush3.bf16.msra.mxu0 %v3033_v52  ;;  %v3093_v52 = vld [vmem:[%s3975_s1 + $0x338] sm:$0xff]  }
  0x31   :  { %2738 = vmatpush3.bf16.msra.mxu1 %v3034_v53  ;;  %2717 = vmatprep.subr.bf16.mxu0 %v3035_v54  ;;  %v3094_v53 = vld [vmem:[%s3975_s1 + $0x3b8] sm:$0xff]   ;;  %v3095_v54 = vld [vmem:[%s3975_s1 + $0x370] sm:$0xff]  }
  0x32   :  { %2739 = vmatprep.subr.bf16.mxu1 %v3036_v55  ;;  %v3096_v55 = vld [vmem:[%s3975_s1 + $0x3f0] sm:$0xff]  }
  0x34   :  { %2718 = vmatpush3.bf16.msra.mxu0 %v3037_v56  ;;  %v3097_v56 = vld [vmem:[%s3975_s1 + $0x330] sm:$0xff]  }
  0x35   :  { %2740 = vmatpush3.bf16.msra.mxu1 %v3038_v57  ;;  %2719 = vmatprep.subr.bf16.mxu0 %v3039_v58  ;;  %v3098_v57 = vld [vmem:[%s3975_s1 + $0x3b0] sm:$0xff]   ;;  %v3099_v58 = vld [vmem:[%s3975_s1 + $0x368] sm:$0xff]  }
  0x36   :  { %2741 = vmatprep.subr.bf16.mxu1 %v3040_v59  ;;  %v3100_v59 = vld [vmem:[%s3975_s1 + $0x3e8] sm:$0xff]  }
  0x38   :  { %2720 = vmatpush3.bf16.msra.mxu0 %v3041_v60  ;;  %v3101_v60 = vld [vmem:[%s3975_s1 + $0x328] sm:$0xff]  }
  0x39   :  { %2742 = vmatpush3.bf16.msra.mxu1 %v3042_v61  ;;  %2721 = vmatprep.subr.bf16.mxu0 %v3043_v62  ;;  %v3102_v61 = vld [vmem:[%s3975_s1 + $0x3a8] sm:$0xff]   ;;  %v3103_v62 = vld [vmem:[%s3975_s1 + $0x360] sm:$0xff]  }
  0x3a   :  { %2743 = vmatprep.subr.bf16.mxu1 %v3044_v63  ;;  %v3104_v63 = vld [vmem:[%s3975_s1 + $0x3e0] sm:$0xff]  }
  0x3c   :  { %2722 = vmatpush3.bf16.msra.mxu0 %v3045_v0  ;;  %v3105_v0 = vld [vmem:[%s3975_s1 + $0x320] sm:$0xff]  }
  0x3d   :  { %2744 = vmatpush3.bf16.msra.mxu1 %v3046_v1  ;;  %2723 = vmatprep.subr.bf16.mxu0 %v3047_v2  ;;  %v3106_v1 = vld [vmem:[%s3975_s1 + $0x3a0] sm:$0xff]   ;;  %v3107_v2 = vld [vmem:[%s3975_s1 + $0x358] sm:$0xff]  }
  0x3e   :  { %2745 = vmatprep.subr.bf16.mxu1 %v3048_v3  ;;  %v3108_v3 = vld [vmem:[%s3975_s1 + $0x3d8] sm:$0xff]  }
  0x40   :  { %2724 = vmatpush3.bf16.msra.mxu0 %v3049_v4  ;;  %v3109_v4 = vld [vmem:[%s3975_s1 + $0x318] sm:$0xff]  }
  0x41   :  { %2746 = vmatpush3.bf16.msra.mxu1 %v3050_v5  ;;  %2753 = vmatprep.subr.bf16.mxu0 %v3055_v12  ;;  %v3110_v5 = vld [vmem:[%s3975_s1 + $0x398] sm:$0xff]   ;;  %v3117_v12 = vld [vmem:[%s3975_s1 + $0x308] sm:$0xff]  }
  0x42   :  { %2775 = vmatprep.subr.bf16.mxu1 %v3056_v13  ;;  %v3118_v13 = vld [vmem:[%s3975_s1 + $0x388] sm:$0xff]  }
  0x43   :  { %1786 = vmatmul.mubr.bf16.vlgmr.msra.gmra.mxu0 %v2435_v7  ;;  %v3112_v7 = vld [vmem:[%s3975_s1 + $0x3d0] sm:$0xff]  }
  0x44   :  { %1826 = vmatmul.mubr.bf16.vlgmr.msra.gmra.mxu1 %v2437_v10  ;;  %2754 = vmatpush3.bf16.msra.mxu0 %v3057_v14  ;;  %v3115_v10 = vld [vmem:[%s3975_s1 + $0x348] sm:$0xff]   ;;  %v3119_v14 = vld [vmem:[%s3975_s1 + $0x340] sm:$0xff]  }
  0x45   :  { %2776 = vmatpush3.bf16.msra.mxu1 %v3058_v15  ;;  %2755 = vmatprep.subr.bf16.mxu0 %v3059_v16  ;;  %v3120_v15 = vld [vmem:[%s3975_s1 + $0x3c0] sm:$0xff]  }
  0x46   :  { %2777 = vmatprep.subr.bf16.mxu1 %v3060_v17  ;;  %1865 = vmatprep.mubr.bf16.mxu0 %v2440_v47  ;;  %v3121_v16 = vld [vmem:[%s3975_s1 + $0x300] sm:$0xff]   ;;  %v3150_v47 = vld [vmem:[%s3975_s1 + $0x490] sm:$0xff]  }
  0x47   :  { %1905 = vmatprep.mubr.bf16.mxu1 %v2442_v49  ;;  %v3122_v17 = vld [vmem:[%s3975_s1 + $0x380] sm:$0xff]   ;;  %v3152_v49 = vld [vmem:[%s3975_s1 + $0x4c8] sm:$0xff]  }
  0x48   :  { %2756 = vmatpush3.bf16.msra.mxu0 %v3061_v18  ;;  %v40_v18 = vld [vmem:[%s3974_s0 + $0x30] sm:$0xff] }
  0x49   :  { %2778 = vmatpush3.bf16.msra.mxu1 %v3062_v19  ;;  %2757 = vmatprep.subr.bf16.mxu0 %v3063_v20  ;;  %v41_v19 = vld [vmem:[%s3974_s0 + $0x38] sm:$0xff]  ;;  %v2443_v20 = vcombine.low %v40_v18, %v40_v18 }
  0x4a   :  { %2779 = vmatprep.subr.bf16.mxu1 %v3064_v21  ;;  %v2444_v21 = vcombine.high %v40_v18, %v40_v18  ;;  %v3183_v18 = vld [vmem:[%s3975_s1 + $0x550] sm:$0xff]  }
  0x4c   :  { %2758 = vmatpush3.bf16.msra.mxu0 %v3065_v22  ;;  %v2445_v22 = vcombine.low %v41_v19, %v41_v19 }
  0x4d   :  { %2780 = vmatpush3.bf16.msra.mxu1 %v3066_v23  ;;  %2759 = vmatprep.subr.bf16.mxu0 %v3067_v24  ;;  %v3127_v23 = vld [vmem:[%s3975_s1 + $0x478] sm:$0xff]   ;;  %v2446_v24 = vcombine.high %v41_v19, %v41_v19  ;;  %v3184_v19 = vld [vmem:[%s3975_s1 + $0x5d0] sm:$0xff]  }
  0x4e   :  { %2781 = vmatprep.subr.bf16.mxu1 %v3068_v25  ;;  %v3128_v25 = vld [vmem:[%s3975_s1 + $0x4f8] sm:$0xff]  }
  0x50   :  { %2760 = vmatpush3.bf16.msra.mxu0 %v3069_v26  ;;  %v3129_v26 = vld [vmem:[%s3975_s1 + $0x438] sm:$0xff]  }
  0x51   :  { %2782 = vmatpush3.bf16.msra.mxu1 %v3070_v27  ;;  %2761 = vmatprep.subr.bf16.mxu0 %v3071_v28  ;;  %v3130_v27 = vld [vmem:[%s3975_s1 + $0x4b8] sm:$0xff]   ;;  %v3131_v28 = vld [vmem:[%s3975_s1 + $0x470] sm:$0xff]  }
  0x52   :  { %2783 = vmatprep.subr.bf16.mxu1 %v3072_v29  ;;  %v3132_v29 = vld [vmem:[%s3975_s1 + $0x4f0] sm:$0xff]  }
  0x54   :  { %2762 = vmatpush3.bf16.msra.mxu0 %v3073_v30  ;;  %v3133_v30 = vld [vmem:[%s3975_s1 + $0x430] sm:$0xff]  }
  0x55   :  { %2784 = vmatpush3.bf16.msra.mxu1 %v3074_v31  ;;  %2763 = vmatprep.subr.bf16.mxu0 %v3075_v32  ;;  %v3134_v31 = vld [vmem:[%s3975_s1 + $0x4b0] sm:$0xff]   ;;  %v3135_v32 = vld [vmem:[%s3975_s1 + $0x468] sm:$0xff]  }
  0x56   :  { %2785 = vmatprep.subr.bf16.mxu1 %v3076_v33  ;;  %v3136_v33 = vld [vmem:[%s3975_s1 + $0x4e8] sm:$0xff]  }
  0x58   :  { %2764 = vmatpush3.bf16.msra.mxu0 %v3077_v34  ;;  %v3137_v34 = vld [vmem:[%s3975_s1 + $0x428] sm:$0xff]  }
  0x59   :  { %2786 = vmatpush3.bf16.msra.mxu1 %v3078_v35  ;;  %2765 = vmatprep.subr.bf16.mxu0 %v3079_v36  ;;  %v3138_v35 = vld [vmem:[%s3975_s1 + $0x4a8] sm:$0xff]   ;;  %v3139_v36 = vld [vmem:[%s3975_s1 + $0x460] sm:$0xff]  }
  0x5a   :  { %2787 = vmatprep.subr.bf16.mxu1 %v3080_v37  ;;  %v3140_v37 = vld [vmem:[%s3975_s1 + $0x4e0] sm:$0xff]  }
  0x5c   :  { %2766 = vmatpush3.bf16.msra.mxu0 %v3081_v38  ;;  %v3141_v38 = vld [vmem:[%s3975_s1 + $0x420] sm:$0xff]  }
  0x5d   :  { %2788 = vmatpush3.bf16.msra.mxu1 %v3082_v39  ;;  %2767 = vmatprep.subr.bf16.mxu0 %v3083_v40  ;;  %v3142_v39 = vld [vmem:[%s3975_s1 + $0x4a0] sm:$0xff]   ;;  %v3143_v40 = vld [vmem:[%s3975_s1 + $0x458] sm:$0xff]  }
  0x5e   :  { %2789 = vmatprep.subr.bf16.mxu1 %v3084_v41  ;;  %v3144_v41 = vld [vmem:[%s3975_s1 + $0x4d8] sm:$0xff]  }
  0x60   :  { %2768 = vmatpush3.bf16.msra.mxu0 %v3085_v42  ;;  %v3145_v42 = vld [vmem:[%s3975_s1 + $0x418] sm:$0xff]  }
  0x61   :  { %2790 = vmatpush3.bf16.msra.mxu1 %v3086_v43  ;;  %2797 = vmatprep.subr.bf16.mxu0 %v3091_v50  ;;  %v3146_v43 = vld [vmem:[%s3975_s1 + $0x498] sm:$0xff]   ;;  %v3153_v50 = vld [vmem:[%s3975_s1 + $0x408] sm:$0xff]  }
  0x62   :  { %2819 = vmatprep.subr.bf16.mxu1 %v3092_v51  ;;  %v3154_v51 = vld [vmem:[%s3975_s1 + $0x488] sm:$0xff]  }
  0x63   :  { %1866 = vmatmul.mubr.bf16.vlgmr.msra.gmra.mxu0 %v2439_v46  ;;  %v3149_v46 = vld [vmem:[%s3975_s1 + $0x410] sm:$0xff]  }
  0x64   :  { %1906 = vmatmul.mubr.bf16.vlgmr.msra.gmra.mxu1 %v2441_v48  ;;  %2798 = vmatpush3.bf16.msra.mxu0 %v3093_v52  ;;  %v3151_v48 = vld [vmem:[%s3975_s1 + $0x448] sm:$0xff]   ;;  %v3155_v52 = vld [vmem:[%s3975_s1 + $0x440] sm:$0xff]  }
  0x65   :  { %2820 = vmatpush3.bf16.msra.mxu1 %v3094_v53  ;;  %2799 = vmatprep.subr.bf16.mxu0 %v3095_v54  ;;  %v3156_v53 = vld [vmem:[%s3975_s1 + $0x4c0] sm:$0xff]  }
  0x66   :  { %2821 = vmatprep.subr.bf16.mxu1 %v3096_v55  ;;  %1945 = vmatprep.mubr.bf16.mxu0 %v2444_v21  ;;  %v3157_v54 = vld [vmem:[%s3975_s1 + $0x400] sm:$0xff]   ;;  %v3186_v21 = vld [vmem:[%s3975_s1 + $0x590] sm:$0xff]  }
  0x67   :  { %1985 = vmatprep.mubr.bf16.mxu1 %v2446_v24  ;;  %v3158_v55 = vld [vmem:[%s3975_s1 + $0x480] sm:$0xff]   ;;  %v3189_v24 = vld [vmem:[%s3975_s1 + $0x508] sm:$0xff]  }
  0x68   :  { %2800 = vmatpush3.bf16.msra.mxu0 %v3097_v56  ;;  %v42_v56 = vld [vmem:[%s3974_s0 + $0x40] sm:$0xff] }
  0x69   :  { %2822 = vmatpush3.bf16.msra.mxu1 %v3098_v57  ;;  %2801 = vmatprep.subr.bf16.mxu0 %v3099_v58  ;;  %v2447_v57 = vcombine.low %v42_v56, %v42_v56  ;;  %v2448_v58 = vcombine.high %v42_v56, %v42_v56 }
  0x6a   :  { %2823 = vmatprep.subr.bf16.mxu1 %v3100_v59  ;;  %v43_v59 = vld [vmem:[%s3974_s0 + $0x48] sm:$0xff] }
  0x6c   :  { %2802 = vmatpush3.bf16.msra.mxu0 %v3101_v60  ;;  %v2449_v60 = vcombine.low %v43_v59, %v43_v59 }
  0x6d   :  { %2824 = vmatpush3.bf16.msra.mxu1 %v3102_v61  ;;  %2803 = vmatprep.subr.bf16.mxu0 %v3103_v62  ;;  %v2450_v61 = vcombine.high %v43_v59, %v43_v59  ;;  %v3163_v62 = vld [vmem:[%s3975_s1 + $0x578] sm:$0xff]  }
  0x6e   :  { %2825 = vmatprep.subr.bf16.mxu1 %v3104_v63  ;;  %v3164_v63 = vld [vmem:[%s3975_s1 + $0x5f8] sm:$0xff]  }
  0x70   :  { %2804 = vmatpush3.bf16.msra.mxu0 %v3105_v0  ;;  %v3165_v0 = vld [vmem:[%s3975_s1 + $0x538] sm:$0xff]  }
  0x71   :  { %2826 = vmatpush3.bf16.msra.mxu1 %v3106_v1  ;;  %2805 = vmatprep.subr.bf16.mxu0 %v3107_v2  ;;  %v3166_v1 = vld [vmem:[%s3975_s1 + $0x5b8] sm:$0xff]   ;;  %v3167_v2 = vld [vmem:[%s3975_s1 + $0x570] sm:$0xff]  }
  0x72   :  { %2827 = vmatprep.subr.bf16.mxu1 %v3108_v3  ;;  %v3168_v3 = vld [vmem:[%s3975_s1 + $0x5f0] sm:$0xff]  }
  0x74   :  { %2806 = vmatpush3.bf16.msra.mxu0 %v3109_v4  ;;  %v3169_v4 = vld [vmem:[%s3975_s1 + $0x530] sm:$0xff]  }
  0x75   :  { %2828 = vmatpush3.bf16.msra.mxu1 %v3110_v5  ;;  %2807 = vmatprep.subr.bf16.mxu0 %v3111_v6  ;;  %v3170_v5 = vld [vmem:[%s3975_s1 + $0x5b0] sm:$0xff]   ;;  %v3171_v6 = vld [vmem:[%s3975_s1 + $0x568] sm:$0xff]  }
  0x76   :  { %2829 = vmatprep.subr.bf16.mxu1 %v3112_v7  ;;  %v3172_v7 = vld [vmem:[%s3975_s1 + $0x5e8] sm:$0xff]  }
  0x78   :  { %2808 = vmatpush3.bf16.msra.mxu0 %v3113_v8  ;;  %v3173_v8 = vld [vmem:[%s3975_s1 + $0x528] sm:$0xff]  }
  0x79   :  { %2830 = vmatpush3.bf16.msra.mxu1 %v3114_v9  ;;  %2809 = vmatprep.subr.bf16.mxu0 %v3115_v10  ;;  %v3174_v9 = vld [vmem:[%s3975_s1 + $0x5a8] sm:$0xff]   ;;  %v3175_v10 = vld [vmem:[%s3975_s1 + $0x560] sm:$0xff]  }
  0x7a   :  { %2831 = vmatprep.subr.bf16.mxu1 %v3116_v11  ;;  %v3176_v11 = vld [vmem:[%s3975_s1 + $0x5e0] sm:$0xff]  }
  0x7c   :  { %2810 = vmatpush3.bf16.msra.mxu0 %v3117_v12  ;;  %v3177_v12 = vld [vmem:[%s3975_s1 + $0x520] sm:$0xff]  }
  0x7d   :  { %2832 = vmatpush3.bf16.msra.mxu1 %v3118_v13  ;;  %2811 = vmatprep.subr.bf16.mxu0 %v3119_v14  ;;  %v3178_v13 = vld [vmem:[%s3975_s1 + $0x5a0] sm:$0xff]   ;;  %v3179_v14 = vld [vmem:[%s3975_s1 + $0x558] sm:$0xff]  }
  0x7e   :  { %2833 = vmatprep.subr.bf16.mxu1 %v3120_v15  ;;  %v3180_v15 = vld [vmem:[%s3975_s1 + $0x5d8] sm:$0xff]  }
  0x80   :  { %2812 = vmatpush3.bf16.msra.mxu0 %v3121_v16  ;;  %v3181_v16 = vld [vmem:[%s3975_s1 + $0x518] sm:$0xff]  }
  0x81   :  { %2834 = vmatpush3.bf16.msra.mxu1 %v3122_v17  ;;  %2841 = vmatprep.subr.bf16.mxu0 %v3127_v23  ;;  %v3182_v17 = vld [vmem:[%s3975_s1 + $0x598] sm:$0xff]   ;;  %v3188_v23 = vld [vmem:[%s3975_s1 + $0x5c8] sm:$0xff]  }
  0x82   :  { %2863 = vmatprep.subr.bf16.mxu1 %v3128_v25  ;;  %v3190_v25 = vld [vmem:[%s3975_s1 + $0x588] sm:$0xff]  }
  0x83   :  { %1946 = vmatmul.mubr.bf16.vlgmr.msra.gmra.mxu0 %v2443_v20  ;;  %v3185_v20 = vld [vmem:[%s3975_s1 + $0x510] sm:$0xff]  }
  0x84   :  { %1986 = vmatmul.mubr.bf16.vlgmr.msra.gmra.mxu1 %v2445_v22  ;;  %2842 = vmatpush3.bf16.msra.mxu0 %v3129_v26  ;;  %v3187_v22 = vld [vmem:[%s3975_s1 + $0x548] sm:$0xff]   ;;  %v3191_v26 = vld [vmem:[%s3975_s1 + $0x540] sm:$0xff]  }
  0x85   :  { %2864 = vmatpush3.bf16.msra.mxu1 %v3130_v27  ;;  %2843 = vmatprep.subr.bf16.mxu0 %v3131_v28  ;;  %v3192_v27 = vld [vmem:[%s3975_s1 + $0x5c0] sm:$0xff]  }
  0x86   :  { %2865 = vmatprep.subr.bf16.mxu1 %v3132_v29  ;;  %2025 = vmatprep.mubr.bf16.mxu0 %v2448_v58  ;;  %v3193_v28 = vld [vmem:[%s3975_s1 + $0x500] sm:$0xff]  }
  0x87   :  { %2065 = vmatprep.mubr.bf16.mxu1 %v2450_v61  ;;  %v3194_v29 = vld [vmem:[%s3975_s1 + $0x580] sm:$0xff]  }
  0x88   :  { %2844 = vmatpush3.bf16.msra.mxu0 %v3133_v30  ;;  %v44_v30 = vld [vmem:[%s3974_s0 + $0x50] sm:$0xff] }
  0x89   :  { %2866 = vmatpush3.bf16.msra.mxu1 %v3134_v31  ;;  %2845 = vmatprep.subr.bf16.mxu0 %v3135_v32  ;;  %v45_v31 = vld [vmem:[%s3974_s0 + $0x58] sm:$0xff]  ;;  %v2451_v32 = vcombine.low %v44_v30, %v44_v30 }
  0x8a   :  { %2867 = vmatprep.subr.bf16.mxu1 %v3136_v33  ;;  %v2452_v33 = vcombine.high %v44_v30, %v44_v30 }
  0x8c   :  { %2846 = vmatpush3.bf16.msra.mxu0 %v3137_v34  ;;  %v2453_v34 = vcombine.low %v45_v31, %v45_v31 }
  0x8d   :  { %2868 = vmatpush3.bf16.msra.mxu1 %v3138_v35  ;;  %2847 = vmatprep.subr.bf16.mxu0 %v3139_v36  ;;  %v2454_v35 = vcombine.high %v45_v31, %v45_v31 }
  0x8e   :  { %2869 = vmatprep.subr.bf16.mxu1 %v3140_v37 }
  0x90   :  { %2848 = vmatpush3.bf16.msra.mxu0 %v3141_v38 }
  0x91   :  { %2870 = vmatpush3.bf16.msra.mxu1 %v3142_v39  ;;  %2849 = vmatprep.subr.bf16.mxu0 %v3143_v40 }
  0x92   :  { %2871 = vmatprep.subr.bf16.mxu1 %v3144_v41 }
  0x94   :  { %2850 = vmatpush3.bf16.msra.mxu0 %v3145_v42 }
  0x95   :  { %2872 = vmatpush3.bf16.msra.mxu1 %v3146_v43  ;;  %2851 = vmatprep.subr.bf16.mxu0 %v3147_v44 }
  0x96   :  { %2873 = vmatprep.subr.bf16.mxu1 %v3148_v45 }
  0x98   :  { %2852 = vmatpush3.bf16.msra.mxu0 %v3149_v46 }
  0x99   :  { %2874 = vmatpush3.bf16.msra.mxu1 %v3150_v47  ;;  %2853 = vmatprep.subr.bf16.mxu0 %v3151_v48 }
  0x9a   :  { %2875 = vmatprep.subr.bf16.mxu1 %v3152_v49 }
  0x9c   :  { %2854 = vmatpush3.bf16.msra.mxu0 %v3153_v50 }
  0x9d   :  { %2876 = vmatpush3.bf16.msra.mxu1 %v3154_v51  ;;  %2855 = vmatprep.subr.bf16.mxu0 %v3155_v52 }
  0x9e   :  { %2877 = vmatprep.subr.bf16.mxu1 %v3156_v53 }
  0xa0   :  { %2856 = vmatpush3.bf16.msra.mxu0 %v3157_v54 }
  0xa1   :  { %2878 = vmatpush3.bf16.msra.mxu1 %v3158_v55  ;;  %2885 = vmatprep.subr.bf16.mxu0 %v3163_v62 }
  0xa2   :  { %2907 = vmatprep.subr.bf16.mxu1 %v3164_v63 }
  0xa3   :  { %2026 = vmatmul.mubr.bf16.vlgmr.msra.gmra.mxu0 %v2447_v57 }
  0xa4   :  { %2066 = vmatmul.mubr.bf16.vlgmr.msra.gmra.mxu1 %v2449_v60  ;;  %2886 = vmatpush3.bf16.msra.mxu0 %v3165_v0 }
  0xa5   :  { %2908 = vmatpush3.bf16.msra.mxu1 %v3166_v1  ;;  %2887 = vmatprep.subr.bf16.mxu0 %v3167_v2 }
  0xa6   :  { %2909 = vmatprep.subr.bf16.mxu1 %v3168_v3  ;;  %2105 = vmatprep.mubr.bf16.mxu0 %v2452_v33 }
  0xa7   :  { %2145 = vmatprep.mubr.bf16.mxu1 %v2454_v35 }
  0xa8   :  { %2888 = vmatpush3.bf16.msra.mxu0 %v3169_v4 }
  0xa9   :  { %2910 = vmatpush3.bf16.msra.mxu1 %v3170_v5  ;;  %2889 = vmatprep.subr.bf16.mxu0 %v3171_v6 }
  0xaa   :  { %2911 = vmatprep.subr.bf16.mxu1 %v3172_v7 }
  0xac   :  { %2890 = vmatpush3.bf16.msra.mxu0 %v3173_v8 }
  0xad   :  { %2912 = vmatpush3.bf16.msra.mxu1 %v3174_v9  ;;  %2891 = vmatprep.subr.bf16.mxu0 %v3175_v10 }
  0xae   :  { %2913 = vmatprep.subr.bf16.mxu1 %v3176_v11 }
  0xb0   :  { %2892 = vmatpush3.bf16.msra.mxu0 %v3177_v12 }
  0xb1   :  { %2914 = vmatpush3.bf16.msra.mxu1 %v3178_v13  ;;  %2893 = vmatprep.subr.bf16.mxu0 %v3179_v14 }
  0xb2   :  { %2915 = vmatprep.subr.bf16.mxu1 %v3180_v15 }
  0xb4   :  { %2894 = vmatpush3.bf16.msra.mxu0 %v3181_v16 }
  0xb5   :  { %2916 = vmatpush3.bf16.msra.mxu1 %v3182_v17  ;;  %2895 = vmatprep.subr.bf16.mxu0 %v3183_v18 }
  0xb6   :  { %2917 = vmatprep.subr.bf16.mxu1 %v3184_v19 }
  0xb8   :  { %2896 = vmatpush3.bf16.msra.mxu0 %v3185_v20 }
  0xb9   :  { %2918 = vmatpush3.bf16.msra.mxu1 %v3186_v21  ;;  %2897 = vmatprep.subr.bf16.mxu0 %v3187_v22 }
  0xba   :  { %2919 = vmatprep.subr.bf16.mxu1 %v3188_v23 }
  0xbc   :  { %2898 = vmatpush3.bf16.msra.mxu0 %v3189_v24 }
  0xbd   :  { %2920 = vmatpush3.bf16.msra.mxu1 %v3190_v25  ;;  %2899 = vmatprep.subr.bf16.mxu0 %v3191_v26 }
  0xbe   :  { %2921 = vmatprep.subr.bf16.mxu1 %v3192_v27 }
  0xc0   :  { %2900 = vmatpush3.bf16.msra.mxu0 %v3193_v28 }
  0xc1   :  { %2922 = vmatpush3.bf16.msra.mxu1 %v3194_v29 }
  0xc3   :  { %2106 = vmatmul.mubr.bf16.vlgmr.msra.gmra.mxu0 %v2451_v32 }
  0xc4   :  { %2146 = vmatmul.mubr.bf16.vlgmr.msra.gmra.mxu1 %v2453_v34 }
  0xc5   :  { %14 = vsyncpa [#allocation3], 0  ;;  %v2430_v38 = vld [vmem:[%s3976_s2] ss:$0 sm:$0xff]  ;;  %v3199_v49 = vld [vmem:[%s3977_s3 + $0x18] sm:$0xff]   ;;  %v3237_v50 = vmov 0.0  }
  0xc6   :  { %2944 = vmatprep.subr.bf16.mxu0 %v3237_v50  ;;  %2956 = vmatprep.subr.bf16.mxu1 %v3237_v50  ;;  %v3200_v57 = vld [vmem:[%s3977_s3 + $0x10] sm:$0xff]   ;;  %v3201_v0 = vld [vmem:[%s3977_s3 + $0x8] sm:$0xff]   ;;  %v3202_v1 = vld [vmem:[%s3977_s3] sm:$0xff]   ;;  %vm3238_vm0 = vmmov 0   ;;  %vm2194_vm1 = vcmask 523264  }
  0xc7   :  { %2945 = vmatpush3.bf16.msra.mxu0 %v3199_v49  ;;  %2952 = vmatprep.mubr.msk.bf16.mxu0 %vm3238_vm0, %v3237_v50  ;;  %v3203_v2 = vld [vmem:[%s3979_s5 + $0x18] sm:$0xff]   ;;  %v3204_v3 = vld [vmem:[%s3979_s5 + $0x10] sm:$0xff]  }
  0xc8   :  { %2946 = vmatprep.subr.bf16.mxu0 %v3237_v50  ;;  %2964 = vmatprep.mubr.msk.bf16.mxu1 %vm3238_vm0, %v3237_v50 }
  0xc9   :  { %2957 = vmatpush3.bf16.msra.mxu1 %v3203_v2 }
  0xca   :  { %2958 = vmatprep.subr.bf16.mxu1 %v3237_v50 }
  0xcb   :  { %2947 = vmatpush3.bf16.msra.mxu0 %v3200_v57  ;;  %v3207_v57 = vld [vmem:[%s3981_s7 + $0x18] sm:$0xff]  }
  0xcc   :  { %2948 = vmatprep.subr.bf16.mxu0 %v3237_v50 }
  0xcd   :  { %2959 = vmatpush3.bf16.msra.mxu1 %v3204_v3  ;;  %v3209_v3 = vld [vmem:[%s3981_s7 + $0x8] sm:$0xff]  }
  0xce   :  { %2960 = vmatprep.subr.bf16.mxu1 %v3237_v50 }
  0xcf   :  { %2949 = vmatpush3.bf16.msra.mxu0 %v3201_v0 }
  0xd0   :  { %2950 = vmatprep.subr.bf16.mxu0 %v3237_v50 }
  0xd3   :  { %2951 = vmatpush3.bf16.msra.mxu0 %v3202_v1 }
  0xd4   :  { %2968 = vmatprep.subr.bf16.mxu0 %v3237_v50 }
  0xe3   :  { %v2681_v36 = vpop.f32.mrf.mxu0 }
  0xe4   :  { %v2703_v37 = vpop.f32.mrf.mxu1 }
  0xe5   :  { %v2682_v39 = vpop.f32.mrf.mxu0 }
  0xe6   :  { %v2704_v40 = vpop.f32.mrf.mxu1  ;;  %v2683_v41 = vadd.f32 %v2682_v39, %v2681_v36 }
  0xe7   :  { %v2705_v42 = vadd.f32 %v2704_v40, %v2703_v37  ;;  %v2684_v43 = vpop.f32.mrf.mxu0 }
  0xe8   :  { %v2706_v44 = vpop.f32.mrf.mxu1  ;;  %v1708_v45 = vadd.f32 %v2683_v41, %v2430_v38 }
  0xe9   :  { %v2685_v46 = vpop.f32.mrf.mxu0 }
  0xea   :  { %v2707_v47 = vpop.f32.mrf.mxu1  ;;  %v1748_v48 = vadd.f32 %v2705_v42, %v1708_v45 }
 0x103   :  { %v2725_v51 = vpop.f32.mrf.mxu0 }
 0x104   :  { %v2747_v52 = vpop.f32.mrf.mxu1 }
 0x105   :  { %v2726_v53 = vpop.f32.mrf.mxu0 }
 0x106   :  { %v2748_v54 = vpop.f32.mrf.mxu1  ;;  %v2727_v55 = vadd.f32 %v2726_v53, %v2725_v51 }
 0x107   :  { %v2749_v56 = vadd.f32 %v2748_v54, %v2747_v52  ;;  %v2728_v58 = vpop.f32.mrf.mxu0 }
 0x108   :  { %v2750_v59 = vpop.f32.mrf.mxu1  ;;  %v1788_v60 = vadd.f32 %v2727_v55, %v1748_v48  ;;  %v3205_v55 = vld [vmem:[%s3979_s5 + $0x8] sm:$0xff]   ;;  %v3208_v58 = vld [vmem:[%s3981_s7 + $0x10] sm:$0xff]  }
 0x109   :  { %v2729_v61 = vpop.f32.mrf.mxu0  ;;  %2961 = vmatpush3.bf16.msra.mxu1 %v3205_v55  ;;  %v2647_v59 = vld [vmem:[%s3978_s4] ss:$0 sm:$0xff] }
 0x10a   :  { %v2751_v62 = vpop.f32.mrf.mxu1  ;;  %v1828_v63 = vadd.f32 %v2749_v56, %v1788_v60  ;;  %2962 = vmatprep.subr.bf16.mxu1 %v3237_v50  ;;  %v3206_v56 = vld [vmem:[%s3979_s5] sm:$0xff]  }
 0x10d   :  { %2963 = vmatpush3.bf16.msra.mxu1 %v3206_v56 }
 0x123   :  { %v2769_v4 = vpop.f32.mrf.mxu0 }
 0x124   :  { %v2791_v5 = vpop.f32.mrf.mxu1 }
 0x125   :  { %v2770_v6 = vpop.f32.mrf.mxu0 }
 0x126   :  { %v2771_v7 = vadd.f32 %v2770_v6, %v2769_v4  ;;  %v2792_v8 = vpop.f32.mrf.mxu1  ;;  %v3210_v4 = vld [vmem:[%s3981_s7] sm:$0xff]  }
 0x127   :  { %v2793_v9 = vadd.f32 %v2792_v8, %v2791_v5  ;;  %v2772_v10 = vpop.f32.mrf.mxu0  ;;  %v2653_v5 = vld [vmem:[%s3980_s6] ss:$0 sm:$0xff]  ;;  %s3239_s6 = smov [#allocation2]  }
 0x128   :  { %v1868_v11 = vadd.f32 %v2771_v7, %v1828_v63  ;;  %v2794_v12 = vpop.f32.mrf.mxu1  ;;  %s2422_s7 = sshll.u32 %s3239_s6, 4  ;;  %s2423_s7 = int_to_ptr.vmem [resolvable:$true] %s2422_s7 }
 0x129   :  { %v2773_v13 = vpop.f32.mrf.mxu0  ;;  %p3220_p1 = scmp.lt.s32.totalorder %s2423_s7, %s2423_s7 }
 0x12a   :  { %v1908_v14 = vadd.f32 %v2793_v9, %v1868_v11  ;;  %v2795_v15 = vpop.f32.mrf.mxu1 }
 0x143   :  { %v2813_v16 = vpop.f32.mrf.mxu0 }
 0x144   :  { %v2835_v17 = vpop.f32.mrf.mxu1 }
 0x145   :  { %v2814_v18 = vpop.f32.mrf.mxu0 }
 0x146   :  { %v2836_v19 = vpop.f32.mrf.mxu1  ;;  %v2815_v32 = vadd.f32 %v2814_v18, %v2813_v16 }
 0x147   :  { %v2816_v20 = vpop.f32.mrf.mxu0  ;;  %v2837_v34 = vadd.f32 %v2836_v19, %v2835_v17 }
 0x148   :  { %v2838_v21 = vpop.f32.mrf.mxu1  ;;  %v1948_v33 = vadd.f32 %v2815_v32, %v1908_v14 }
 0x149   :  { %v2817_v22 = vpop.f32.mrf.mxu0 }
 0x14a   :  { %v2839_v23 = vpop.f32.mrf.mxu1  ;;  %v1988_v36 = vadd.f32 %v2837_v34, %v1948_v33 }
 0x163   :  { %v2857_v24 = vpop.f32.mrf.mxu0 }
 0x164   :  { %v2879_v25 = vpop.f32.mrf.mxu1 }
 0x165   :  { %v2858_v26 = vpop.f32.mrf.mxu0 }
 0x166   :  { %v2880_v27 = vpop.f32.mrf.mxu1  ;;  %v2859_v35 = vadd.f32 %v2858_v26, %v2857_v24 }
 0x167   :  { %v2860_v28 = vpop.f32.mrf.mxu0  ;;  %v2881_v38 = vadd.f32 %v2880_v27, %v2879_v25 }
 0x168   :  { %v2882_v29 = vpop.f32.mrf.mxu1  ;;  %v2028_v37 = vadd.f32 %v2859_v35, %v1988_v36 }
 0x169   :  { %v2861_v30 = vpop.f32.mrf.mxu0 }
 0x16a   :  { %v2883_v31 = vpop.f32.mrf.mxu1  ;;  %v2068_v42 = vadd.f32 %v2881_v38, %v2028_v37 }
 0x183   :  { %v2901_v39 = vpop.f32.mrf.mxu0 }
 0x184   :  { %v2923_v40 = vpop.f32.mrf.mxu1 }
 0x185   :  { %v2902_v41 = vpop.f32.mrf.mxu0 }
 0x186   :  { %v2903_v43 = vadd.f32 %v2902_v41, %v2901_v39  ;;  %v2924_v44 = vpop.f32.mrf.mxu1 }
 0x187   :  { %v2904_v45 = vpop.f32.mrf.mxu0  ;;  %v2925_v47 = vadd.f32 %v2924_v44, %v2923_v40 }
 0x188   :  { %v2108_v46 = vadd.f32 %v2903_v43, %v2068_v42  ;;  %v2926_v48 = vpop.f32.mrf.mxu1 }
 0x189   :  { %v2905_v49 = vpop.f32.mrf.mxu0 }
 0x18a   :  { %v2148_v51 = vadd.f32 %v2925_v47, %v2108_v46  ;;  %v2927_v52 = vpop.f32.mrf.mxu1 }
 0x18c   :  { %v2153_v53 = vmax.f32 %v2148_v51, 0.0 }
 0x18e   :  { %v2154_v54 = vpack.c.bf16 %v2153_v53, %v2153_v53 }
 0x190   :  { %2953 = vmatmul.mubr.msk.bf16.vlgmr.msra.gmra.mxu0 %vm2194_vm1, %v2154_v54 }
 0x191   :  { %2976 = vmatprep.mubr.msk.bf16.mxu0 %vm3238_vm0, %v3237_v50  ;;  %2969 = vmatpush3.bf16.msra.mxu0 %v3207_v57 }
 0x192   :  { %2970 = vmatprep.subr.bf16.mxu0 %v3237_v50 }
 0x195   :  { %2971 = vmatpush3.bf16.msra.mxu0 %v3208_v58 }
 0x196   :  { %2972 = vmatprep.subr.bf16.mxu0 %v3237_v50 }
 0x199   :  { %2973 = vmatpush3.bf16.msra.mxu0 %v3209_v3 }
 0x19a   :  { %2974 = vmatprep.subr.bf16.mxu0 %v3237_v50  ;;  %v2659_v50 = vld [vmem:[%s3982_s8] ss:$0 sm:$0xff]  ;;  %s3215_s8 = scalar_lea.vmem %s2423_s7, 128 }
 0x19b   :  { %p3216_p0 = scmp.ne.s32.totalorder %s2423_s7, %s3215_s8  ;;  %p3221_p2 = scmp.lt.s32.totalorder %s3215_s8, %s3215_s8 }
 0x19d   :  { %2975 = vmatpush3.bf16.msra.mxu0 %v3210_v4  ;;  %p3222_p3 = por %p3221_p2, %p3220_p1 }
 0x19f   :  { %p3223_p4 = pnand %p3222_p3, %p3216_p0 }
 0x250   :  { %v2232_v60 = vpop.f32.mrf.mxu0 }
 0x251   :  { %v2233_v61 = vadd.f32 %v2647_v59, %v2232_v60 }
 0x252   :  { %v2954_v62 = vpop.f32.mrf.mxu0 }
 0x253   :  { %v2238_v63 = vmax.f32 %v2233_v61, 0.0 }
 0x254   :  { %v2235_v0 = vpop.f32.mrf.mxu0 }
 0x255   :  { %v2239_v1 = vpack.c.bf16 %v2238_v63, %v2238_v63 }
 0x256   :  { %v2955_v2 = vpop.f32.mrf.mxu0 }
 0x257   :  { %2965 = vmatmul.mubr.msk.bf16.vlgmr.msra.gmra.mxu1 %vm2194_vm1, %v2239_v1 }
 0x317   :  { %v2316_v6 = vpop.f32.mrf.mxu1 }
 0x318   :  { %v2317_v7 = vadd.f32 %v2653_v5, %v2316_v6 }
 0x319   :  { %v2966_v8 = vpop.f32.mrf.mxu1 }
 0x31a   :  { %v2322_v9 = vmax.f32 %v2317_v7, 0.0 }
 0x31b   :  { %v2319_v10 = vpop.f32.mrf.mxu1 }
 0x31c   :  { %v2323_v11 = vpack.c.bf16 %v2322_v9, %v2322_v9 }
 0x31d   :  { %v2967_v12 = vpop.f32.mrf.mxu1 }
 0x31e   :  { %2977 = vmatmul.mubr.msk.bf16.vlgmr.msra.gmra.mxu0 %vm2194_vm1, %v2323_v11 }
 0x3de   :  { %v2400_v13 = vpop.f32.mrf.mxu0 }
 0x3df   :  { %v2401_v14 = vadd.f32 %v2659_v50, %v2400_v13 }
 0x3e0   :  { %v2978_v15 = vpop.f32.mrf.mxu0 }
 0x3e1   :  { %2406 = vmax.xlane.f32.xlu0 %v2401_v14 }
 0x3e2   :  { %v2403_v16 = vpop.f32.mrf.mxu0 }
 0x3e4   :  { %v2979_v17 = vpop.f32.mrf.mxu0 }
 0x46a   :  { %v2407_v18 = vpop.xlane.xlu0 %2406 }
 0x46b   :  { %v2408_v19 = vsub.f32 %v2401_v14, %v2407_v18 }
 0x46d   :  { %v2409_v20 = vmul.f32 1.442695, %v2408_v19 }
 0x46f   :  { %3211 = vpow2.f32 %v2409_v20 }
 0x47c   :  { %v3212_v21 = vpop.eup %3211 }
 0x47d   :  { %2411 = vadd.xlane.f32.xlu0 %v3212_v21 }
 0x506   :  { %v2412_v22 = vpop.xlane.xlu0 %2411 }
 0x507   :  { %3213 = vrcp.f32 %v2412_v22 }
 0x514   :  { %v3214_v23 = vpop.eup %3213 }
 0x515   :  { %v2414_v24 = vmul.f32 %v3214_v23, %v3212_v21 }
 0x517   :  { %2415 = vst [vmem:[#allocation2] sm:$0xff] %v2414_v24 }
 0x518   :  { %3226 = shalt.err (!%p3223_p4)
}
 0x519   :  { %2425 = dma.vmem_to_hbm [thread:$0]  %s2423_s7, 128, %s3983_s9, [#allocation3]  }
 0x51a   :  { %3235 = dma.done.wait [#allocation3], 128  }
 0x51b   :  { %3236 = vsyncadd [#allocation3], 4294967168 }
 0x51c   :  { %2429 = vsyncpa [#allocation3], 1 }

</bundles_post_ra>
